<compile_context>
chip_gen: v7x
topology: tpu7x:2x2x1
jax: 0.10.0
libtpu: 0.0.40
codegen_flags: <defaults>
</compile_context>

<pallas_src>
import functools
import math

import jax
import jax.numpy as jnp
from jax import lax
from jax.experimental import pallas as pl
from jax.experimental.pallas import tpu as pltpu


# ---------------------------------------------------------------------------
# Fused kernel: QKV projection + per-head attention + output projection for
# one batch element per grid step.
# ---------------------------------------------------------------------------
def _mha_fused_kernel(x_ref, wqkv_ref, bqkv_ref, wo_ref, bo_ref, *out_refs,
                      scale, nh, D, mxu_dtype, emit_prob):
    if emit_prob:
        prob_ref, out_ref = out_refs
    else:
        (out_ref,) = out_refs

    A = nh * D

    x = x_ref[...].astype(mxu_dtype)          # (S, H)
    wqkv = wqkv_ref[...]                      # (H, 3A), already mxu_dtype
    # One wide MXU matmul for all heads / all of Q,K,V (f32 accumulation).
    qkv = jnp.dot(x, wqkv, preferred_element_type=jnp.float32) + bqkv_ref[...]   # (S, 3A) f32

    head_outs = []
    for h in range(nh):                       # static unroll, nh is small/static
        q = qkv[:, h * D:(h + 1) * D]                     # (S, D) static lane slices
        k = qkv[:, A + h * D:A + (h + 1) * D]             # (S, D)
        v = qkv[:, 2 * A + h * D:2 * A + (h + 1) * D]     # (S, D)

        # scores = q @ k^T without materializing a transposed K operand.
        scores = lax.dot_general(
            q.astype(mxu_dtype), k.astype(mxu_dtype),
            dimension_numbers=(((1,), (1,)), ((), ())),
            preferred_element_type=jnp.float32) * scale   # (S, S)

        # Numerically-stable softmax, kept in f32 on every chip generation.
        m = jnp.max(scores, axis=-1, keepdims=True)
        e = jnp.exp(scores - m)
        denom = jnp.sum(e, axis=-1, keepdims=True)
        prob = e * pl.reciprocal(denom, approx=False)     # (S, S)
        # TODO(synk): training-mode dropout on prob not implemented (eval mode = identity).

        if emit_prob:
            prob_ref[h] = prob                            # (nh, S, S) block, batch squeezed

        head_outs.append(
            jnp.dot(prob.astype(mxu_dtype), v.astype(mxu_dtype),
                    preferred_element_type=jnp.float32))  # (S, D)

    # Lane-dense concatenated head output, stays in VMEM.
    concat = jnp.concatenate(head_outs, axis=-1)          # (S, A)

    # Fused output projection (saves a second kernel + HBM round trip).
    out = jnp.dot(concat.astype(mxu_dtype), wo_ref[...],
                  preferred_element_type=jnp.float32) + bo_ref[...]
    # TODO(synk): training-mode dropout on the projected output not implemented.
    out_ref[...] = out.astype(out_ref.dtype)


# ---------------------------------------------------------------------------
# Wrapper: packs weights, builds specs, matches the PyTorch return convention.
# ---------------------------------------------------------------------------
def multi_head_attention(x, params, *, output_attention=False,
                         mxu_dtype=jnp.float32):
    """Pallas implementation of MultiHead.forward (inference mode).

    Returns (attention_prob, attention_output) if output_attention else
    (attention_output, None) -- same ordering as the PyTorch module.
    """
    B, S, H = x.shape
    wq = params["wq"]                   # (nh, H, D)
    nh, _, D = wq.shape
    A = nh * D
    scale = 1.0 / math.sqrt(float(D))

    # Pack per-head Q/K/V weights into one lane-dense (H, 3A) slab so the QKV
    # projection is a single wide matmul and a single (invariant) DMA.
    def pack_w(w):                      # (nh, H, D) -> (H, A)
        return jnp.transpose(w, (1, 0, 2)).reshape(H, A)

    wqkv = jnp.concatenate(
        [pack_w(params["wq"]), pack_w(params["wk"]), pack_w(params["wv"])],
        axis=-1).astype(mxu_dtype)                                   # (H, 3A)
    bqkv = jnp.concatenate(
        [params["bq"].reshape(1, A), params["bk"].reshape(1, A),
         params["bv"].reshape(1, A)], axis=-1).astype(jnp.float32)   # (1, 3A)
    wo = params["wo"].astype(mxu_dtype)                              # (A, H)
    bo = params["bo"].astype(jnp.float32)                            # (1, H)

    kernel = functools.partial(
        _mha_fused_kernel, scale=scale, nh=nh, D=D,
        mxu_dtype=mxu_dtype, emit_prob=output_attention)

    in_specs = [
        pl.BlockSpec((None, S, H), lambda b: (b, 0, 0)),    # x: one batch element/step
        pl.BlockSpec((H, 3 * A), lambda b: (0, 0)),         # packed QKV weight (grid-invariant)
        pl.BlockSpec((1, 3 * A), lambda b: (0, 0)),         # packed QKV bias
        pl.BlockSpec((A, H), lambda b: (0, 0)),             # output projection weight
        pl.BlockSpec((1, H), lambda b: (0, 0)),             # output projection bias
    ]

    if output_attention:
        out_shape = (
            jax.ShapeDtypeStruct((nh, B, S, S), jnp.float32),   # stacked attention probs
            jax.ShapeDtypeStruct((B, S, H), x.dtype),           # projected output
        )
        out_specs = (
            pl.BlockSpec((nh, None, S, S), lambda b: (0, b, 0, 0)),
            pl.BlockSpec((None, S, H), lambda b: (b, 0, 0)),
        )
    else:
        out_shape = jax.ShapeDtypeStruct((B, S, H), x.dtype)
        out_specs = pl.BlockSpec((None, S, H), lambda b: (b, 0, 0))

    result = pl.pallas_call(
        kernel,
        out_shape=out_shape,
        grid=(B,),
        in_specs=in_specs,
        out_specs=out_specs,
        # NOTE: for full ViT shapes on v7x (64 MiB VMEM), set
        # vmem_limit_bytes explicitly and re-check tile sizing.
        compiler_params=pltpu.CompilerParams(
            dimension_semantics=("parallel",)),
    )(x, wqkv, bqkv, wo, bo)

    if output_attention:
        prob, out = result
        return prob, out
    return result, None


# ---------------------------------------------------------------------------
# Pure-JAX reference (mirrors the PyTorch forward in eval mode)
# ---------------------------------------------------------------------------
def _reference(x, params):
    wq, bq = params["wq"], params["bq"]
    wk, bk = params["wk"], params["bk"]
    wv, bv = params["wv"], params["bv"]
    nh, H, D = wq.shape
    probs, outs = [], []
    for h in range(nh):
        q = x @ wq[h] + bq[h]
        k = x @ wk[h] + bk[h]
        v = x @ wv[h] + bv[h]
        s = (q @ jnp.swapaxes(k, -1, -2)) / math.sqrt(float(D))
        p = jax.nn.softmax(s, axis=-1)
        probs.append(p)
        outs.append(p @ v)
    cat = jnp.concatenate(outs, axis=-1)
    out = cat @ params["wo"] + params["bo"][0]
    return jnp.stack(probs, axis=0), out


def init_params(key, hidden_dim, num_heads):
    D = hidden_dim // num_heads
    A = num_heads * D
    ks = jax.random.split(key, 8)
    s = 1.0 / math.sqrt(hidden_dim)
    return {
        "wq": jax.random.uniform(ks[0], (num_heads, hidden_dim, D), jnp.float32, -s, s),
        "bq": jax.random.uniform(ks[1], (num_heads, D), jnp.float32, -s, s),
        "wk": jax.random.uniform(ks[2], (num_heads, hidden_dim, D), jnp.float32, -s, s),
        "bk": jax.random.uniform(ks[3], (num_heads, D), jnp.float32, -s, s),
        "wv": jax.random.uniform(ks[4], (num_heads, hidden_dim, D), jnp.float32, -s, s),
        "bv": jax.random.uniform(ks[5], (num_heads, D), jnp.float32, -s, s),
        "wo": jax.random.uniform(ks[6], (A, hidden_dim), jnp.float32, -s, s),
        "bo": jax.random.uniform(ks[7], (1, hidden_dim), jnp.float32, -s, s),
    }


if __name__ == "__main__":
    B, S, HIDDEN, NUM_HEADS = 2, 8, 32, 4

    key = jax.random.PRNGKey(0)
    kx, kp = jax.random.split(key)
    x = jax.random.normal(kx, (B, S, HIDDEN), jnp.float32)
    params = init_params(kp, HIDDEN, NUM_HEADS)

    ref_prob, ref_out = _reference(x, params)

    # 1) f32 path with attention probabilities -- exact-semantics check.
    prob, out = multi_head_attention(x, params, output_attention=True)
    prob = jax.block_until_ready(prob)
    out = jax.block_until_ready(out)
    assert prob.shape == (NUM_HEADS, B, S, S)
    assert out.shape == (B, S, HIDDEN)
    assert jnp.allclose(prob, ref_prob, atol=1e-5, rtol=1e-5)
    assert jnp.allclose(out, ref_out, atol=1e-5, rtol=1e-5)

    # 2) f32 path without probabilities (probs never written to HBM).
    out_only, none_val = multi_head_attention(x, params, output_attention=False)
    out_only = jax.block_until_ready(out_only)
    assert none_val is None
    assert jnp.allclose(out_only, ref_out, atol=1e-5, rtol=1e-5)

    # 3) bf16-MXU path (f32 accumulation / softmax) -- the perf configuration
    #    for v5e/v6e/v7x; checked with a loose tolerance.
    prob_bf, out_bf = multi_head_attention(
        x, params, output_attention=True, mxu_dtype=jnp.bfloat16)
    prob_bf = jax.block_until_ready(prob_bf)
    out_bf = jax.block_until_ready(out_bf)
    assert jnp.allclose(prob_bf, ref_prob, atol=1e-1, rtol=1e-1)
    assert jnp.allclose(out_bf, ref_out, atol=1e-1, rtol=1e-1)

    print("KERNEL_OK")
</pallas_src>

<mosaic_0001>
module attributes {stable_mosaic.version = 11 : i64} {
  func.func @_mha_fused_kernel(%arg0: i32, %arg1: memref<1x8x32xf32, #tpu.memory_space<vmem>>, %arg2: memref<32x96xf32, #tpu.memory_space<vmem>>, %arg3: memref<1x96xf32, #tpu.memory_space<vmem>>, %arg4: memref<32x32xf32, #tpu.memory_space<vmem>>, %arg5: memref<1x32xf32, #tpu.memory_space<vmem>>, %arg6: memref<4x1x8x8xf32, #tpu.memory_space<vmem>>, %arg7: memref<1x8x32xf32, #tpu.memory_space<vmem>>) attributes {dimension_semantics = [#tpu.dimension_semantics<parallel>], iteration_bounds = array<i64: 2>, scalar_prefetch = 0 : i64, scratch_operands = 0 : i64, tpu.core_type = #tpu.core_type<tc>, window_params = [{transform_indices = @transform_0, window_bounds = array<i64: 1, 8, 32>}, {pipeline_mode = #tpu.pipeline_mode<synchronous>, transform_indices = @transform_1, window_bounds = array<i64: 32, 96>}, {pipeline_mode = #tpu.pipeline_mode<synchronous>, transform_indices = @transform_2, window_bounds = array<i64: 1, 96>}, {pipeline_mode = #tpu.pipeline_mode<synchronous>, transform_indices = @transform_3, window_bounds = array<i64: 32, 32>}, {pipeline_mode = #tpu.pipeline_mode<synchronous>, transform_indices = @transform_4, window_bounds = array<i64: 1, 32>}, {transform_indices = @transform_5, window_bounds = array<i64: 4, 1, 8, 8>}, {transform_indices = @transform_6, window_bounds = array<i64: 1, 8, 32>}]} {
    %c0 = arith.constant 0 : index
    %c0_0 = arith.constant 0 : index
    %c0_1 = arith.constant 0 : index
    %0 = vector.load %arg1[%c0, %c0_0, %c0_1] : memref<1x8x32xf32, #tpu.memory_space<vmem>>, vector<1x8x32xf32>
    %1 = vector.shape_cast %0 : vector<1x8x32xf32> to vector<8x32xf32>
    %c0_2 = arith.constant 0 : index
    %c0_3 = arith.constant 0 : index
    %2 = vector.load %arg2[%c0_2, %c0_3] : memref<32x96xf32, #tpu.memory_space<vmem>>, vector<32x96xf32>
    %cst = arith.constant dense<0.000000e+00> : vector<8x96xf32>
    %3 = tpu.matmul %1, %2, %cst {dimension_numbers = #tpu.dot_dimension_numbers<[1], [0], [0], [1], [0, 0, 1, 1], [], []>} : vector<8x32xf32>, vector<32x96xf32>, vector<8x96xf32> -> vector<8x96xf32>
    %c0_4 = arith.constant 0 : index
    %c0_5 = arith.constant 0 : index
    %4 = vector.load %arg3[%c0_4, %c0_5] : memref<1x96xf32, #tpu.memory_space<vmem>>, vector<1x96xf32>
    %5 = vector.broadcast %4 : vector<1x96xf32> to vector<8x96xf32>
    %6 = arith.addf %3, %5 : vector<8x96xf32>
    %7 = vector.extract_strided_slice %6 {offsets = [0, 0], sizes = [8, 8], strides = [1, 1]} : vector<8x96xf32> to vector<8x8xf32>
    %8 = vector.extract_strided_slice %6 {offsets = [0, 32], sizes = [8, 8], strides = [1, 1]} : vector<8x96xf32> to vector<8x8xf32>
    %9 = vector.extract_strided_slice %6 {offsets = [0, 64], sizes = [8, 8], strides = [1, 1]} : vector<8x96xf32> to vector<8x8xf32>
    %cst_6 = arith.constant dense<0.000000e+00> : vector<8x8xf32>
    %10 = tpu.matmul %7, %8, %cst_6 {dimension_numbers = #tpu.dot_dimension_numbers<[1], [1], [0], [0], [0, 0, 1, 0], [], []>} : vector<8x8xf32>, vector<8x8xf32>, vector<8x8xf32> -> vector<8x8xf32>
    %cst_7 = arith.constant 0.353553385 : f32
    %11 = vector.broadcast %cst_7 : f32 to vector<8x8xf32>
    %12 = arith.mulf %10, %11 : vector<8x8xf32>
    %cst_8 = arith.constant dense<0xFF800000> : vector<8xf32>
    %13 = vector.multi_reduction <maximumf>, %12, %cst_8 [1] : vector<8x8xf32> to vector<8xf32>
    %14 = vector.shape_cast %13 : vector<8xf32> to vector<8x1xf32>
    %15 = vector.broadcast %14 : vector<8x1xf32> to vector<8x8xf32>
    %16 = arith.subf %12, %15 : vector<8x8xf32>
    %17 = math.exp %16 : vector<8x8xf32>
    %cst_9 = arith.constant dense<0.000000e+00> : vector<8xf32>
    %18 = vector.multi_reduction <add>, %17, %cst_9 [1] : vector<8x8xf32> to vector<8xf32>
    %19 = vector.shape_cast %18 : vector<8xf32> to vector<8x1xf32>
    %20 = tpu.reciprocal %19 : vector<8x1xf32> -> vector<8x1xf32>
    %21 = vector.broadcast %20 : vector<8x1xf32> to vector<8x8xf32>
    %22 = arith.mulf %17, %21 : vector<8x8xf32>
    %c0_10 = arith.constant 0 : index
    %c0_11 = arith.constant 0 : index
    %c0_12 = arith.constant 0 : index
    %c0_13 = arith.constant 0 : index
    %23 = vector.load %arg6[%c0_10, %c0_11, %c0_12, %c0_13] : memref<4x1x8x8xf32, #tpu.memory_space<vmem>>, vector<1x1x8x8xf32>
    %24 = vector.shape_cast %23 : vector<1x1x8x8xf32> to vector<8x8xf32>
    %25 = vector.shape_cast %22 : vector<8x8xf32> to vector<1x1x8x8xf32>
    tpu.vector_store %arg6[%c0_10, %c0_11, %c0_12, %c0_13], %25 {strides = array<i32>} : memref<4x1x8x8xf32, #tpu.memory_space<vmem>>, vector<1x1x8x8xf32>,
    %cst_14 = arith.constant dense<0.000000e+00> : vector<8x8xf32>
    %26 = tpu.matmul %22, %9, %cst_14 {dimension_numbers = #tpu.dot_dimension_numbers<[1], [0], [0], [1], [0, 0, 1, 1], [], []>} : vector<8x8xf32>, vector<8x8xf32>, vector<8x8xf32> -> vector<8x8xf32>
    %27 = vector.extract_strided_slice %6 {offsets = [0, 8], sizes = [8, 8], strides = [1, 1]} : vector<8x96xf32> to vector<8x8xf32>
    %28 = vector.extract_strided_slice %6 {offsets = [0, 40], sizes = [8, 8], strides = [1, 1]} : vector<8x96xf32> to vector<8x8xf32>
    %29 = vector.extract_strided_slice %6 {offsets = [0, 72], sizes = [8, 8], strides = [1, 1]} : vector<8x96xf32> to vector<8x8xf32>
    %cst_15 = arith.constant dense<0.000000e+00> : vector<8x8xf32>
    %30 = tpu.matmul %27, %28, %cst_15 {dimension_numbers = #tpu.dot_dimension_numbers<[1], [1], [0], [0], [0, 0, 1, 0], [], []>} : vector<8x8xf32>, vector<8x8xf32>, vector<8x8xf32> -> vector<8x8xf32>
    %cst_16 = arith.constant 0.353553385 : f32
    %31 = vector.broadcast %cst_16 : f32 to vector<8x8xf32>
    %32 = arith.mulf %30, %31 : vector<8x8xf32>
    %cst_17 = arith.constant dense<0xFF800000> : vector<8xf32>
    %33 = vector.multi_reduction <maximumf>, %32, %cst_17 [1] : vector<8x8xf32> to vector<8xf32>
    %34 = vector.shape_cast %33 : vector<8xf32> to vector<8x1xf32>
    %35 = vector.broadcast %34 : vector<8x1xf32> to vector<8x8xf32>
    %36 = arith.subf %32, %35 : vector<8x8xf32>
    %37 = math.exp %36 : vector<8x8xf32>
    %cst_18 = arith.constant dense<0.000000e+00> : vector<8xf32>
    %38 = vector.multi_reduction <add>, %37, %cst_18 [1] : vector<8x8xf32> to vector<8xf32>
    %39 = vector.shape_cast %38 : vector<8xf32> to vector<8x1xf32>
    %40 = tpu.reciprocal %39 : vector<8x1xf32> -> vector<8x1xf32>
    %41 = vector.broadcast %40 : vector<8x1xf32> to vector<8x8xf32>
    %42 = arith.mulf %37, %41 : vector<8x8xf32>
    %c1 = arith.constant 1 : index
    %c0_19 = arith.constant 0 : index
    %c0_20 = arith.constant 0 : index
    %c0_21 = arith.constant 0 : index
    %43 = vector.load %arg6[%c1, %c0_19, %c0_20, %c0_21] : memref<4x1x8x8xf32, #tpu.memory_space<vmem>>, vector<1x1x8x8xf32>
    %44 = vector.shape_cast %43 : vector<1x1x8x8xf32> to vector<8x8xf32>
    %45 = vector.shape_cast %42 : vector<8x8xf32> to vector<1x1x8x8xf32>
    tpu.vector_store %arg6[%c1, %c0_19, %c0_20, %c0_21], %45 {strides = array<i32>} : memref<4x1x8x8xf32, #tpu.memory_space<vmem>>, vector<1x1x8x8xf32>,
    %cst_22 = arith.constant dense<0.000000e+00> : vector<8x8xf32>
    %46 = tpu.matmul %42, %29, %cst_22 {dimension_numbers = #tpu.dot_dimension_numbers<[1], [0], [0], [1], [0, 0, 1, 1], [], []>} : vector<8x8xf32>, vector<8x8xf32>, vector<8x8xf32> -> vector<8x8xf32>
    %47 = vector.extract_strided_slice %6 {offsets = [0, 16], sizes = [8, 8], strides = [1, 1]} : vector<8x96xf32> to vector<8x8xf32>
    %48 = vector.extract_strided_slice %6 {offsets = [0, 48], sizes = [8, 8], strides = [1, 1]} : vector<8x96xf32> to vector<8x8xf32>
    %49 = vector.extract_strided_slice %6 {offsets = [0, 80], sizes = [8, 8], strides = [1, 1]} : vector<8x96xf32> to vector<8x8xf32>
    %cst_23 = arith.constant dense<0.000000e+00> : vector<8x8xf32>
    %50 = tpu.matmul %47, %48, %cst_23 {dimension_numbers = #tpu.dot_dimension_numbers<[1], [1], [0], [0], [0, 0, 1, 0], [], []>} : vector<8x8xf32>, vector<8x8xf32>, vector<8x8xf32> -> vector<8x8xf32>
    %cst_24 = arith.constant 0.353553385 : f32
    %51 = vector.broadcast %cst_24 : f32 to vector<8x8xf32>
    %52 = arith.mulf %50, %51 : vector<8x8xf32>
    %cst_25 = arith.constant dense<0xFF800000> : vector<8xf32>
    %53 = vector.multi_reduction <maximumf>, %52, %cst_25 [1] : vector<8x8xf32> to vector<8xf32>
    %54 = vector.shape_cast %53 : vector<8xf32> to vector<8x1xf32>
    %55 = vector.broadcast %54 : vector<8x1xf32> to vector<8x8xf32>
    %56 = arith.subf %52, %55 : vector<8x8xf32>
    %57 = math.exp %56 : vector<8x8xf32>
    %cst_26 = arith.constant dense<0.000000e+00> : vector<8xf32>
    %58 = vector.multi_reduction <add>, %57, %cst_26 [1] : vector<8x8xf32> to vector<8xf32>
    %59 = vector.shape_cast %58 : vector<8xf32> to vector<8x1xf32>
    %60 = tpu.reciprocal %59 : vector<8x1xf32> -> vector<8x1xf32>
    %61 = vector.broadcast %60 : vector<8x1xf32> to vector<8x8xf32>
    %62 = arith.mulf %57, %61 : vector<8x8xf32>
    %c2 = arith.constant 2 : index
    %c0_27 = arith.constant 0 : index
    %c0_28 = arith.constant 0 : index
    %c0_29 = arith.constant 0 : index
    %63 = vector.load %arg6[%c2, %c0_27, %c0_28, %c0_29] : memref<4x1x8x8xf32, #tpu.memory_space<vmem>>, vector<1x1x8x8xf32>
    %64 = vector.shape_cast %63 : vector<1x1x8x8xf32> to vector<8x8xf32>
    %65 = vector.shape_cast %62 : vector<8x8xf32> to vector<1x1x8x8xf32>
    tpu.vector_store %arg6[%c2, %c0_27, %c0_28, %c0_29], %65 {strides = array<i32>} : memref<4x1x8x8xf32, #tpu.memory_space<vmem>>, vector<1x1x8x8xf32>,
    %cst_30 = arith.constant dense<0.000000e+00> : vector<8x8xf32>
    %66 = tpu.matmul %62, %49, %cst_30 {dimension_numbers = #tpu.dot_dimension_numbers<[1], [0], [0], [1], [0, 0, 1, 1], [], []>} : vector<8x8xf32>, vector<8x8xf32>, vector<8x8xf32> -> vector<8x8xf32>
    %67 = vector.extract_strided_slice %6 {offsets = [0, 24], sizes = [8, 8], strides = [1, 1]} : vector<8x96xf32> to vector<8x8xf32>
    %68 = vector.extract_strided_slice %6 {offsets = [0, 56], sizes = [8, 8], strides = [1, 1]} : vector<8x96xf32> to vector<8x8xf32>
    %69 = vector.extract_strided_slice %6 {offsets = [0, 88], sizes = [8, 8], strides = [1, 1]} : vector<8x96xf32> to vector<8x8xf32>
    %cst_31 = arith.constant dense<0.000000e+00> : vector<8x8xf32>
    %70 = tpu.matmul %67, %68, %cst_31 {dimension_numbers = #tpu.dot_dimension_numbers<[1], [1], [0], [0], [0, 0, 1, 0], [], []>} : vector<8x8xf32>, vector<8x8xf32>, vector<8x8xf32> -> vector<8x8xf32>
    %cst_32 = arith.constant 0.353553385 : f32
    %71 = vector.broadcast %cst_32 : f32 to vector<8x8xf32>
    %72 = arith.mulf %70, %71 : vector<8x8xf32>
    %cst_33 = arith.constant dense<0xFF800000> : vector<8xf32>
    %73 = vector.multi_reduction <maximumf>, %72, %cst_33 [1] : vector<8x8xf32> to vector<8xf32>
    %74 = vector.shape_cast %73 : vector<8xf32> to vector<8x1xf32>
    %75 = vector.broadcast %74 : vector<8x1xf32> to vector<8x8xf32>
    %76 = arith.subf %72, %75 : vector<8x8xf32>
    %77 = math.exp %76 : vector<8x8xf32>
    %cst_34 = arith.constant dense<0.000000e+00> : vector<8xf32>
    %78 = vector.multi_reduction <add>, %77, %cst_34 [1] : vector<8x8xf32> to vector<8xf32>
    %79 = vector.shape_cast %78 : vector<8xf32> to vector<8x1xf32>
    %80 = tpu.reciprocal %79 : vector<8x1xf32> -> vector<8x1xf32>
    %81 = vector.broadcast %80 : vector<8x1xf32> to vector<8x8xf32>
    %82 = arith.mulf %77, %81 : vector<8x8xf32>
    %c3 = arith.constant 3 : index
    %c0_35 = arith.constant 0 : index
    %c0_36 = arith.constant 0 : index
    %c0_37 = arith.constant 0 : index
    %83 = vector.load %arg6[%c3, %c0_35, %c0_36, %c0_37] : memref<4x1x8x8xf32, #tpu.memory_space<vmem>>, vector<1x1x8x8xf32>
    %84 = vector.shape_cast %83 : vector<1x1x8x8xf32> to vector<8x8xf32>
    %85 = vector.shape_cast %82 : vector<8x8xf32> to vector<1x1x8x8xf32>
    tpu.vector_store %arg6[%c3, %c0_35, %c0_36, %c0_37], %85 {strides = array<i32>} : memref<4x1x8x8xf32, #tpu.memory_space<vmem>>, vector<1x1x8x8xf32>,
    %cst_38 = arith.constant dense<0.000000e+00> : vector<8x8xf32>
    %86 = tpu.matmul %82, %69, %cst_38 {dimension_numbers = #tpu.dot_dimension_numbers<[1], [0], [0], [1], [0, 0, 1, 1], [], []>} : vector<8x8xf32>, vector<8x8xf32>, vector<8x8xf32> -> vector<8x8xf32>
    %87 = tpu.concatenate %26, %46, %66, %86 in 1 : vector<8x8xf32>, vector<8x8xf32>, vector<8x8xf32>, vector<8x8xf32> -> vector<8x32xf32>
    %c0_39 = arith.constant 0 : index
    %c0_40 = arith.constant 0 : index
    %88 = vector.load %arg4[%c0_39, %c0_40] : memref<32x32xf32, #tpu.memory_space<vmem>>, vector<32x32xf32>
    %cst_41 = arith.constant dense<0.000000e+00> : vector<8x32xf32>
    %89 = tpu.matmul %87, %88, %cst_41 {dimension_numbers = #tpu.dot_dimension_numbers<[1], [0], [0], [1], [0, 0, 1, 1], [], []>} : vector<8x32xf32>, vector<32x32xf32>, vector<8x32xf32> -> vector<8x32xf32>
    %c0_42 = arith.constant 0 : index
    %c0_43 = arith.constant 0 : index
    %90 = vector.load %arg5[%c0_42, %c0_43] : memref<1x32xf32, #tpu.memory_space<vmem>>, vector<1x32xf32>
    %91 = vector.broadcast %90 : vector<1x32xf32> to vector<8x32xf32>
    %92 = arith.addf %89, %91 : vector<8x32xf32>
    %c0_44 = arith.constant 0 : index
    %c0_45 = arith.constant 0 : index
    %c0_46 = arith.constant 0 : index
    %93 = vector.load %arg7[%c0_44, %c0_45, %c0_46] : memref<1x8x32xf32, #tpu.memory_space<vmem>>, vector<1x8x32xf32>
    %94 = vector.shape_cast %93 : vector<1x8x32xf32> to vector<8x32xf32>
    %95 = vector.shape_cast %92 : vector<8x32xf32> to vector<1x8x32xf32>
    tpu.vector_store %arg7[%c0_44, %c0_45, %c0_46], %95 {strides = array<i32>} : memref<1x8x32xf32, #tpu.memory_space<vmem>>, vector<1x8x32xf32>,
    return
  }
  func.func @transform_0(%arg0: i32) -> (i32, i32, i32) {
    %c0_i32 = arith.constant 0 : i32
    %c0_i32_0 = arith.constant 0 : i32
    %c0_i32_1 = arith.constant 0 : i32
    return %arg0, %c0_i32, %c0_i32_0 : i32, i32, i32
  }
  func.func @transform_1(%arg0: i32) -> (i32, i32) {
    %c0_i32 = arith.constant 0 : i32
    %c0_i32_0 = arith.constant 0 : i32
    %c0_i32_1 = arith.constant 0 : i32
    return %c0_i32, %c0_i32_0 : i32, i32
  }
  func.func @transform_2(%arg0: i32) -> (i32, i32) {
    %c0_i32 = arith.constant 0 : i32
    %c0_i32_0 = arith.constant 0 : i32
    %c0_i32_1 = arith.constant 0 : i32
    return %c0_i32, %c0_i32_0 : i32, i32
  }
  func.func @transform_3(%arg0: i32) -> (i32, i32) {
    %c0_i32 = arith.constant 0 : i32
    %c0_i32_0 = arith.constant 0 : i32
    %c0_i32_1 = arith.constant 0 : i32
    return %c0_i32, %c0_i32_0 : i32, i32
  }
  func.func @transform_4(%arg0: i32) -> (i32, i32) {
    %c0_i32 = arith.constant 0 : i32
    %c0_i32_0 = arith.constant 0 : i32
    %c0_i32_1 = arith.constant 0 : i32
    return %c0_i32, %c0_i32_0 : i32, i32
  }
  func.func @transform_5(%arg0: i32) -> (i32, i32, i32, i32) {
    %c0_i32 = arith.constant 0 : i32
    %c0_i32_0 = arith.constant 0 : i32
    %c0_i32_1 = arith.constant 0 : i32
    %c0_i32_2 = arith.constant 0 : i32
    return %c0_i32, %arg0, %c0_i32_0, %c0_i32_1 : i32, i32, i32, i32
  }
  func.func @transform_6(%arg0: i32) -> (i32, i32, i32) {
    %c0_i32 = arith.constant 0 : i32
    %c0_i32_0 = arith.constant 0 : i32
    %c0_i32_1 = arith.constant 0 : i32
    return %arg0, %c0_i32, %c0_i32_0 : i32, i32, i32
  }
}

</mosaic_0001>

<bundles_post_ra>
// kernel: tpu_custom_call.1
= control target key start
LH: loop header
LB: loop body
LE: loop exit
PB: predicated region body
PF: predicated region fallthrough
CT: control target
= control target key end

     0   :  { %s2180_s0 = inlined_call_operand.hbm [shape: f32[2,8,32], index: 0, kind: input, shape index: {}]   ;;  %s2181_s1 = inlined_call_operand.hbm [shape: f32[32,96], index: 1, kind: input, shape index: {}]   ;;  %s2182_s2 = inlined_call_operand.vmem [shape: f32[1,96], index: 2, kind: input, shape index: {}]   ;;  %s2183_s3 = inlined_call_operand.hbm [shape: f32[32,32], index: 3, kind: input, shape index: {}]   ;;  %s2184_s4 = inlined_call_operand.vmem [shape: f32[1,32], index: 4, kind: input, shape index: {}]   ;;  %s2185_s5 = inlined_call_operand.hbm [shape: f32[4,2,8,8], index: 5, kind: output, shape index: {0}]   ;;  %s2186_s6 = inlined_call_operand.hbm [shape: f32[2,8,32], index: 6, kind: output, shape index: {1}]  }
   0x1   :  { %2190 = sst [smem:[#allocation15_spill]] %s2180_s0 }
   0x2   :  { %12 = vsyncpa [#allocation3], 0 }
   0x3   :  { %14 = vsyncpa [#allocation3 + $0x1], 0 }
   0x4   :  { %15 = vsyncpa [#allocation6], 0 }
   0x5   :  { %16 = vsyncpa [#allocation4], 0 }
   0x6   :  { %18 = vsyncpa [#allocation4 + $0x1], 0 }
   0x7   :  { %19 = vsyncpa [#allocation10], 0 }
   0x8   :  { %21 = vsyncpa [#allocation10 + $0x1], 0  ;;  %s1819_s21 = smov 0   ;;  %s1821_s22 = smov 0  }
   0x9   :  { %s1823_s23 = smov 0   ;;  %s1825_s24 = smov 0  }
   0xa LB: > { %s1840_s25 = sadd.s32 4294967295, %s1756_s24   ;;  %s1321_s26 = sadd.s32 4294967294, %s1756_s24   ;;  %s1756_s24 = sphi %s1825_s24, %s2208_s24   ;;  %s1752_s23 = sphi %s1823_s23, %s2207_s23   ;;  %s1748_s22 = sphi %s1821_s22, %s2206_s22   ;;  %s1744_s21 = sphi %s1819_s21, %s2205_s21  }
   0xb   : > { %p47_p0 = scmp.ne.s32.totalorder %s1748_s22, %s1744_s21  ;;  %p2187_p1 = scmp.eq.s32.totalorder %s1840_s25, 0 }
   0xc   : > { %p161_p3 = scmp.eq.s32.totalorder %s1321_s26, 1  ;;  %p1322_p5 = scmp.ge.s32.totalorder %s1756_s24, 1 }
   0xd   : > { %p1849_p4 = por %p2187_p1, %p47_p0  ;;  %p194_p7 = scmp.lt.s32.totalorder %s1756_s24, 3 }
   0xe   : > { %p1854_p6 = por %p161_p3, %p47_p0  ;;  %s1758_s30 = smov [#allocation5]  }
   0xf   : > { %s2191_s27 = scalar_select %p1849_p4, 1, 0 }
  0x10   : > { %s2192_s28 = scalar_select %p1854_p6, 1, 0 }
  0x11   : > { %p1859_p8 = pnand %p1322_p5, %p194_p7  ;;  %s206_s7 = sshll.u32 %s1758_s30, 4  ;;  %s1863_s7 = int_to_ptr.vmem [resolvable:$true] %s206_s7 }
  0x12   : > { %s1759_s9 = smov [#allocation7]   ;;  %s1568_s13 = scalar_lea.hbm %s2181_s1, 512 }
  0x13   : > { %p1473_p9 = pneg %p1859_p8  ;;  %s222_s10 = sshll.u32 %s1759_s9, 4  ;;  %s1874_s10 = int_to_ptr.vmem [resolvable:$true] %s222_s10 }
  0x14   : > { %p1569_p12 = scmp.ne.s32.totalorder %s2181_s1, %s1568_s13  ;;  %p1575_p5 = scmp.lt.u32.totalorder %s1568_s13, %s2181_s1 }
  0x15   : > { %p1870_p11 = pnand %p1473_p9, %p2187_p1 }
  0x17   : > { %p1570_p13 = pneg %p1870_p11 }
  0x19   : > { %p1571_p0 = pnand %p1570_p13, %p1569_p12 }
  0x1b   : > { %p1572_p3 = pneg %p1571_p0 }
  0x1d   : > { %p1577_p7 = pnand %p1575_p5, %p1572_p3 }
  0x1f   : > { %1580 = shalt.err (!%p1577_p7)
}
  0x20   : > { %s1581_s18 = scalar_lea.vmem %s1863_s7, 512  ;;  %p1589_p2 = scmp.lt.s32.totalorder %s1863_s7, %s1863_s7 }
  0x21   : > { %p1582_p9 = scmp.ne.s32.totalorder %s1863_s7, %s1581_s18  ;;  %p1590_p12 = scmp.lt.s32.totalorder %s1581_s18, %s1581_s18 }
  0x23   : > { %p1584_p10 = pnand %p1582_p9, %p1570_p13  ;;  %p1591_p0 = por %p1590_p12, %p1589_p2 }
  0x25   : > { %p1585_p1 = pneg %p1584_p10 }
  0x27   : > { %p1592_p6 = pnand %p1591_p0, %p1585_p1 }
  0x29   : > { %1595 = shalt.err (!%p1592_p6)
}
  0x2a   : > { %s1760_s19 = smov 128   ;;  %s1761_s20 = smov 8  }
  0x2b   : > { %1476 = dma.hbm_to_vmem [thread:$0]  (!%p1870_p11), %s2181_s1, 512, %s1863_s7, [#allocation6], %s1760_s19, %s1760_s19, %s1761_s20  }
  0x2c   : > { %s1596_s12 = scalar_lea.hbm %s2183_s3, 512 }
  0x2d   : > { %p1597_p2 = scmp.ne.s32.totalorder %s2183_s3, %s1596_s12  ;;  %p1603_p10 = scmp.lt.u32.totalorder %s1596_s12, %s2183_s3 }
  0x2f   : > { %p1599_p1 = pnand %p1597_p2, %p1570_p13 }
  0x31   : > { %p1600_p6 = pneg %p1599_p1 }
  0x33   : > { %p1605_p3 = pnand %p1603_p10, %p1600_p6 }
  0x35   : > { %1608 = shalt.err (!%p1605_p3)
}
  0x36   : > { %s1609_s7 = scalar_lea.vmem %s1874_s10, 512  ;;  %p1617_p12 = scmp.lt.s32.totalorder %s1874_s10, %s1874_s10 }
  0x37   : > { %p1610_p5 = scmp.ne.s32.totalorder %s1874_s10, %s1609_s7  ;;  %p1618_p0 = scmp.lt.s32.totalorder %s1609_s7, %s1609_s7 }
  0x39   : > { %p1612_p7 = pnand %p1610_p5, %p1570_p13  ;;  %p1619_p2 = por %p1618_p0, %p1617_p12 }
  0x3b   : > { %p1613_p9 = pneg %p1612_p7 }
  0x3d   : > { %p1620_p1 = pnand %p1619_p2, %p1613_p9 }
  0x3f   : > { %1623 = shalt.err (!%p1620_p1)
}
  0x40   : > { %1479 = dma.hbm_to_vmem [thread:$0]  (!%p1870_p11), %s2183_s3, 512, %s1874_s10, [#allocation6], %s1760_s19, %s1760_s19, %s1761_s20  }
  0x41   : > { %s1929_s26 = sadd.s32 1, %s1756_s24   ;;  %s34_s8 = sadd.s32 1, %s1752_s23 }
  0x42   : > { %s31_s30 = ssub.s32 %s1756_s24, %s1929_s26  ;;  %p41_p13 = scmp.ne.s32.totalorder %s1752_s23, %s1748_s22 }
  0x43   : > { %p32_p6 = scmp.eq.s32.totalorder %s31_s30, 0  ;;  %p42_p10 = scmp.eq.s32.totalorder %s1756_s24, 0 }
  0x44   : > { %p2195_p3 = scmp.eq.s32.totalorder %s1840_s25, 1  ;;  %p1493_p7 = scmp.lt.s32.totalorder %s1756_s24, 2 }
  0x45   : > { %s1945_s11 = scalar_select %p32_p6, %s1752_s23, %s34_s8  }
  0x46   : > { %p1939_p5 = por %p2195_p3, %p41_p13  ;;  %p43_p9 = por %p42_p10, %p41_p13 }
  0x47   : > { %s239_s12 = sand.u32 1, %s1752_s23   ;;  %s1327_s10 = sshll.u32 %s1756_s24, 7 }
  0x48   : > { %s2196_s9 = scalar_select %p1939_p5, 1, 0 }
  0x49   : > { %s1326_s13 = sshll.u32 %s239_s12, 3  ;;  %s2197_s0 = sld [smem:[#allocation15_spill]] }
  0x4a   : > { %s243_s15 = scalar_lea.vmem [#allocation2], %s1326_s13  ;;  %p1956_p11 = pnand %p1493_p7, %p43_p9 }
  0x4b   : > { %s250_s16 = sshll.u32 %s243_s15, 4  ;;  %s240_s17 = scalar_lea.sflag [#allocation3], %s239_s12  ;;  %s1954_s16 = int_to_ptr.vmem [resolvable:$true] %s250_s16 }
  0x4c   : > { %p1626_p0 = pneg %p1956_p11 }
  0x4f   : > { %s1952_s14 = scalar_lea.hbm %s2197_s0, %s1327_s10  ;;  %s1629_s13 = scalar_lea.hbm %s2197_s0, 256 }
  0x50   : > { %s1624_s18 = scalar_lea.hbm %s1952_s14, 128  ;;  %p1630_p13 = scmp.lt.u32.totalorder %s1952_s14, %s2197_s0 }
  0x51   : > { %p1625_p12 = scmp.ne.s32.totalorder %s1952_s14, %s1624_s18  ;;  %p1631_p6 = scmp.lt.u32.totalorder %s1629_s13, %s1624_s18 }
  0x52   : > { %p1633_p3 = scmp.lt.u32.totalorder %s1624_s18, %s1952_s14 }
  0x53   : > { %p1627_p2 = pnand %p1626_p0, %p1625_p12  ;;  %p1632_p10 = por %p1631_p6, %p1630_p13 }
  0x55   : > { %p1628_p1 = pneg %p1627_p2  ;;  %p1634_p7 = por %p1633_p3, %p1632_p10 }
  0x57   : > { %p1635_p9 = pnand %p1634_p7, %p1628_p1 }
  0x59   : > { %1638 = shalt.err (!%p1635_p9)
}
  0x5a   : > { %s1639_s12 = scalar_lea.vmem %s1954_s16, 128  ;;  %s1762_s20 = smov [#allocation2]  }
  0x5b   : > { %p1640_p12 = scmp.ne.s32.totalorder %s1954_s16, %s1639_s12  ;;  %s1644_s15 = sshll.u32 %s1762_s20, 4  ;;  %s1645_s15 = int_to_ptr.vmem [resolvable:$false] %s1644_s15 }
  0x5c   : > { %s1646_s8 = scalar_lea.vmem %s1645_s15, 256  ;;  %p1647_p4 = scmp.lt.s32.totalorder %s1954_s16, %s1645_s15 }
  0x5d   : > { %p1642_p2 = pnand %p1640_p12, %p1626_p0  ;;  %p1648_p13 = scmp.lt.s32.totalorder %s1646_s8, %s1639_s12 }
  0x5f   : > { %p1643_p5 = pneg %p1642_p2  ;;  %p1649_p6 = por %p1648_p13, %p1647_p4 }
  0x61   : > { %p1650_p10 = pnand %p1649_p6, %p1643_p5 }
  0x63   : > { %1653 = shalt.err (!%p1650_p10)
}
  0x64   : > { %1483 = dma.hbm_to_vmem [thread:$0]  (!%p1956_p11), %s1952_s14, 128, %s1954_s16, %s240_s17  }
  0x65   : > { %259 = sbr.rel (%p1859_p8) target bundleno = 2118 (0x846), region = 40  ;;  %s1988_s18 = sand.u32 (!%p1859_p8), 1, %s1748_s22  }
  0x66   : > { %s1329_s30 = sshll.u32 (!%p1859_p8), %s1988_s18, 3  ;;  %s262_s13 = scalar_lea.sflag (!%p1859_p8), [#allocation3], %s1988_s18 }
  0x67   : > { %s265_s10 = scalar_lea.vmem (!%p1859_p8), [#allocation2], %s1329_s30  ;;  %p2199_p4 = scmp.ne.s32.totalorder (!%p1859_p8), %s2191_s27, 0 }
  0x6c   : > { %1727 = dma.done.wait (%p2199_p4), %s262_s13, 128  }
  0x6d   : > { %1729 = vsyncadd (%p2199_p4), %s262_s13, 4294967168  ;;  %p2200_p5 = scmp.eq.s32.totalorder %s1840_s25, 0 }
  0x6f   : > { %1731 = dma.done.wait (%p2200_p5), [#allocation6], 1024   ;;  %p2201_p8 = pmov %p2200_p5 }
  0x70   : > { %v1763_v0 = vmov 0.0|0.0   ;;  %vm1764_vm0 = vmmov 0   ;;  %v1765_v1 = vmov 0.0   ;;  %v308_v2 = vld [vmem:[#allocation5] sm:$0xff]  ;;  %v309_v3 = vld [vmem:[#allocation5 + $0x8] sm:$0xff]  ;;  %v310_v4 = vld [vmem:[#allocation5 + $0x10] sm:$0xff] }
  0x71   : > { %1733 = vsyncadd (%p2201_p8), [#allocation6], 4294966272  ;;  %1447 = vmatprep.subr.bf16.mxu0 %v1763_v0  ;;  %1393 = vmatprep.mubr.msk.f32.mxu0 %vm1764_vm0, %v1765_v1  ;;  %v1448_v5 = vpack.c.bf16 %v309_v3, %v308_v2  ;;  %v311_v6 = vld [vmem:[#allocation5 + $0x18] sm:$0xff]  ;;  %vm319_vm1 = vcmask 261120   ;;  %v1334_v9 = vld [vmem:[%s2182_s2] ss:$0 sm:$0xff] }
  0x72   : > { %1396 = vmatprep.subr.mxu1 %v1765_v1  ;;  %1398 = vmatprep.mubr.msk.f32.mxu1 %vm1764_vm0, %v1765_v1  ;;  %v1451_v7 = vpack.c.bf16 %v311_v6, %v310_v4  ;;  %v307_v8 = vld [vmem:[%s265_s10] sm:$0xff]  ;;  %s1766_s14 = smov 64   ;;  %s1767_s16 = smov 96   ;;  %vm396_vm2 = vcmask 64512   ;;  %vm1077_vm3 = vcmask 130048   ;;  %vm1079_vm4 = vcmask 195584  }
  0x73   : > { %1449 = vmatpush3.bf16.msra.mxu0 %v1448_v5  ;;  %s1768_s7 = smov 88   ;;  %s1769_s17 = smov 120  }
  0x74   : > { %1450 = vmatprep.subr.bf16.mxu0 %v1763_v0  ;;  %s1770_s19 = smov 80   ;;  %s1771_s12 = smov 72  }
  0x75   : > { %s1772_s20 = smov 112   ;;  %s1773_s15 = smov 104  }
  0x76   : > { %s1332_s8 = sshll.u32 %s1988_s18, 5  ;;  %s1774_s10 = smov 56  }
  0x77   : > { %1452 = vmatpush3.bf16.msra.mxu0 %v1451_v7  ;;  %s2046_s13 = scalar_lea.vmem [#allocation8], %s1332_s8  ;;  %s1775_s27 = smov 48  }
  0x78   : > { %1416 = vmatprep.subr.mxu0 %v1765_v1  ;;  %s1776_s29 = smov 40   ;;  %s1167_s8 = scalar_lea.sflag [#allocation4], %s1988_s18 }
  0x79   : > { %p2202_p0 = scmp.ne.s32.totalorder %s2196_s9, 0 }
  0x7a   : > { %1394 = vmatmul.mubr.msk.f32.vlgmr.msra.gmra.mrb[0].mxu0 %vm319_vm1, %v307_v8 }
  0x7b   : > { %1418 = vmatprep.mubr.msk.f32.mxu0 %vm1764_vm0, %v1765_v1 }
 0x14d   : > { %v389_v10 = vpop.f32.mrb[0].mxu0 }
 0x14e   : > { %v2016_v11 = vadd.f32 %v1334_v9, %v389_v10  ;;  %v1395_v12 = vpop.f32.mrb[1].mxu0 }
 0x14f   : > { %v1081_v12 = vld [vmem:[#allocation7] sm:$0xff] }
 0x150   : > { %484 = vrot.lane.b32.xlu1 %v2016_v11, %s1766_s14  ;;  %394 = vrot.lane.b32.xlu0 %v2016_v11, %s1767_s16  ;;  %s1777_s14 = smov 8   ;;  %s1778_s16 = smov 16  }
 0x154   : > { %562 = vrot.lane.b32.xlu1 %v2016_v11, %s1768_s7  ;;  %s1779_s7 = smov 24  }
 0x158   : > { %560 = vrot.lane.b32.xlu1 %v2016_v11, %s1769_s17  ;;  %s1355_s17 = sshll.u32 %s1840_s25, 7 }
 0x15c   : > { %730 = vrot.lane.b32.xlu1 %v2016_v11, %s1770_s19 }
 0x1c2   : > { %v485_v13 = vpop.permute.xlu1 %484  ;;  %v395_v14 = vpop.permute.xlu0 %394 }
 0x1c3   : > { %1397 = vmatpush3.xpose.msk.msra.mxu1 %vm396_vm2, %v395_v14 }
 0x1c4   : > { %1401 = vmatprep.subr.mxu1 %v1765_v1 }
 0x1c6   : > { %v563_v15 = vpop.permute.xlu1 %562  ;;  %1399 = vmatmul.mubr.msk.f32.vlgmr.msra.gmra.mrb[0].mxu1 %vm396_vm2, %v2016_v11 }
 0x1c7   : > { %1402 = vmatpush3.msra.mxu1 %v485_v13  ;;  %1403 = vmatprep.mubr.msk.f32.mxu1 %vm1764_vm0, %v1765_v1  ;;  %v1082_v13 = vld [vmem:[#allocation7 + $0x8] sm:$0xff] }
 0x1c8   : > { %1406 = vmatprep.subr.mxu1 %v1765_v1  ;;  %v1454_v14 = vpack.c.bf16 %v1082_v13, %v1081_v12 }
 0x1ca   : > { %v561_v16 = vpop.permute.xlu1 %560 }
 0x1ce   : > { %v731_v17 = vpop.permute.xlu1 %730 }
 0x1cf   : > { %1417 = vmatpush3.xpose.msk.msra.mxu0 %vm396_vm2, %v731_v17 }
 0x1d0   : > { %1426 = vmatprep.subr.mxu0 %v1765_v1 }
 0x299   : > { %v467_v18 = vpop.f32.mrb[0].mxu1 }
 0x29a   : > { %v471_v19 = vmul.f32 0.35355338, %v467_v18  ;;  %v1400_v20 = vpop.f32.mrb[1].mxu1 }
 0x29c   : > { %v472_v21 = vsel %vm396_vm2, %v471_v19, -inf }
 0x29d   : > { %473 = vmax.xlane.f32.xlu0 %v472_v21 }
 0x2b3   : > { %898 = vrot.lane.b32.xlu0 %v2016_v11, %s1771_s12 }
 0x32a   : > { %v474_v22 = vpop.xlane.xlu0 %473 }
 0x32b   : > { %v475_v23 = vsub.f32 %v471_v19, %v474_v22 }
 0x32d   : > { %v476_v24 = vmul.f32 1.442695, %v475_v23 }
 0x32e   : > { %v899_v29 = vpop.permute.xlu0 %898 }
 0x32f   : > { %1552 = vpow2.f32 %v476_v24 }
 0x339   : > { %v1553_v25 = vpop.eup %1552 }
 0x33a   : > { %v478_v26 = vsel %vm396_vm2, %v1553_v25, 0.0 }
 0x33b   : > { %479 = vadd.xlane.f32.xlu1 %v478_v26 }
 0x34c   : > { %728 = vrot.lane.b32.xlu1 %v2016_v11, %s1772_s20  ;;  %s2095_s20 = scalar_lea.hbm %s2185_s5, %s1355_s17 }
 0x350   : > { %896 = vrot.lane.b32.xlu1 %v2016_v11, %s1773_s15  ;;  %s1184_s15 = sshll.u32 %s2046_s13, 4  ;;  %s2098_s15 = int_to_ptr.vmem [resolvable:$true] %s1184_s15 }
 0x3c8   : > { %v480_v27 = vpop.xlane.xlu1 %479 }
 0x3c9   : > { %1554 = vrcp.f32 %v480_v27 }
 0x3cc   : > { %v729_v28 = vpop.permute.xlu1 %728 }
 0x3cd   : > { %1419 = vmatmul.mubr.msk.f32.vlgmr.msra.gmra.mrb[2].mxu0 %vm396_vm2, %v729_v28 }
 0x3ce   : > { %1427 = vmatpush3.xpose.msk.msra.mxu0 %vm396_vm2, %v899_v29  ;;  %1428 = vmatprep.mubr.msk.f32.mxu0 %vm1764_vm0, %v1765_v1 }
 0x3cf   : > { %1453 = vmatprep.subr.bf16.mxu0 %v1763_v0 }
 0x3d0   : > { %v897_v30 = vpop.permute.xlu1 %896 }
 0x3d1   : > { %1429 = vmatmul.mubr.msk.f32.vlgmr.msra.gmra.mrb[4].mxu0 %vm396_vm2, %v897_v30 }
 0x3d2   : > { %1444 = vmatprep.mubr.msk.f32.mxu0 %vm1764_vm0, %v1765_v1  ;;  %1455 = vmatpush3.bf16.msra.mxu0 %v1454_v14 }
 0x3d3   : > { %v1555_v31 = vpop.eup %1554  ;;  %1456 = vmatprep.subr.bf16.mxu0 %v1763_v0 }
 0x3d4   : > { %v482_v32 = vmul.f32 %v1555_v31, %v1553_v25 }
 0x3d6   : > { %483 = vst.msk [vmem:[%s2046_s13] sm:$0xff] %vm396_vm2, %v482_v32  ;;  %1404 = vmatmul.mubr.msk.f32.vlgmr.msra.gmra.mrb[2].mxu1 %vm396_vm2, %v482_v32 }
 0x3d7   : > { %1407 = vmatpush3.xpose.msk.msra.mxu1 %vm396_vm2, %v563_v15  ;;  %1408 = vmatprep.mubr.msk.f32.mxu1 %vm1764_vm0, %v1765_v1  ;;  %v1083_v15 = vld [vmem:[#allocation7 + $0x10] sm:$0xff] }
 0x3d8   : > { %1411 = vmatprep.subr.mxu1 %v1765_v1 }
 0x3da   : > { %1409 = vmatmul.mubr.msk.f32.vlgmr.msra.gmra.mrb[4].mxu1 %vm396_vm2, %v561_v16  ;;  %v1084_v16 = vld [vmem:[#allocation7 + $0x18] sm:$0xff] }
 0x3db   : > { %1413 = vmatprep.mubr.msk.f32.mxu1 %vm1764_vm0, %v1765_v1  ;;  %v1457_v17 = vpack.c.bf16 %v1084_v16, %v1083_v15 }
 0x3dd   : > { %1458 = vmatpush3.bf16.msra.mxu0 %v1457_v17 }
 0x4a0   : > { %v802_v33 = vpop.f32.mrb[2].mxu0 }
 0x4a1   : > { %v806_v34 = vmul.f32 0.35355338, %v802_v33  ;;  %v1420_v35 = vpop.f32.mrb[3].mxu0 }
 0x4a3   : > { %v807_v36 = vsel %vm396_vm2, %v806_v34, -inf }
 0x4a4   : > { %808 = vmax.xlane.f32.xlu0 %v807_v36  ;;  %v970_v37 = vpop.f32.mrb[4].mxu0 }
 0x4a5   : > { %v1430_v38 = vpop.f32.mrb[5].mxu0  ;;  %v974_v44 = vmul.f32 0.35355338, %v970_v37 }
 0x4a7   : > { %v975_v46 = vsel %vm396_vm2, %v974_v44, -inf }
 0x4a9   : > { %v2059_v39 = vpop.f32.mrb[2].mxu1 }
 0x4aa   : > { %v1405_v40 = vpop.f32.mrb[3].mxu1 }
 0x4ad   : > { %v634_v41 = vpop.f32.mrb[4].mxu1 }
 0x4ae   : > { %v638_v42 = vmul.f32 0.35355338, %v634_v41  ;;  %v1410_v43 = vpop.f32.mrb[5].mxu1 }
 0x4b0   : > { %v639_v45 = vsel %vm396_vm2, %v638_v42, -inf }
 0x4b1   : > { %640 = vmax.xlane.f32.xlu1 %v639_v45 }
 0x4b5   : > { %976 = vmax.xlane.f32.xlu1 %v975_v46 }
 0x531   : > { %v809_v47 = vpop.xlane.xlu0 %808 }
 0x532   : > { %v810_v48 = vsub.f32 %v806_v34, %v809_v47 }
 0x534   : > { %v811_v49 = vmul.f32 1.442695, %v810_v48 }
 0x536   : > { %1556 = vpow2.f32 %v811_v49 }
 0x53e   : > { %v641_v50 = vpop.xlane.xlu1 %640 }
 0x53f   : > { %v642_v58 = vsub.f32 %v638_v42, %v641_v50 }
 0x540   : > { %v1557_v51 = vpop.eup %1556 }
 0x541   : > { %v813_v52 = vsel %vm396_vm2, %v1557_v51, 0.0  ;;  %v643_v59 = vmul.f32 1.442695, %v642_v58 }
 0x542   : > { %814 = vadd.xlane.f32.xlu1 %v813_v52  ;;  %v977_v53 = vpop.xlane.xlu1 %976 }
 0x543   : > { %v978_v54 = vsub.f32 %v974_v44, %v977_v53 }
 0x545   : > { %v979_v55 = vmul.f32 1.442695, %v978_v54 }
 0x547   : > { %1558 = vpow2.f32 %v979_v55 }
 0x548   : > { %1560 = vpow2.f32 %v643_v59 }
 0x551   : > { %v1559_v56 = vpop.eup %1558 }
 0x552   : > { %v981_v57 = vsel %vm396_vm2, %v1559_v56, 0.0  ;;  %v1561_v60 = vpop.eup %1560 }
 0x553   : > { %652 = vrot.lane.b32.xlu1 %v2016_v11, %s1774_s10  ;;  %982 = vadd.xlane.f32.xlu0 %v981_v57  ;;  %v645_v61 = vsel %vm396_vm2, %v1561_v60, 0.0  ;;  %s1654_s10 = scalar_lea.vmem %s2098_s15, 512 }
 0x554   : > { %p1655_p11 = scmp.ne.s32.totalorder %s2098_s15, %s1654_s10 }
 0x556   : > { %p1656_p1 = pnand %p1655_p11, %p2202_p0 }
 0x558   : > { %p1657_p3 = pneg %p1656_p1 }
 0x569   : > { %820 = vrot.lane.b32.xlu0 %v2016_v11, %s1775_s27  ;;  %s1780_s27 = smov [#allocation8]  }
 0x577   : > { %646 = vadd.xlane.f32.xlu1 %v645_v61 }
 0x588   : > { %988 = vrot.lane.b32.xlu1 %v2016_v11, %s1776_s29  ;;  %s1658_s29 = sshll.u32 %s1780_s27, 4  ;;  %s1659_s29 = int_to_ptr.vmem [resolvable:$false] %s1658_s29 }
 0x589   : > { %p1661_p7 = scmp.lt.s32.totalorder %s2098_s15, %s1659_s29 }
 0x5cf   : > { %v815_v62 = vpop.xlane.xlu1 %814 }
 0x5d0   : > { %1562 = vrcp.f32 %v815_v62 }
 0x5d3   : > { %v653_v63 = vpop.permute.xlu1 %652 }
 0x5d4   : > { %1412 = vmatpush3.msra.mxu1 %v653_v63 }
 0x5d5   : > { %1421 = vmatprep.subr.mxu1 %v1765_v1 }
 0x5da   : > { %v1563_v2 = vpop.eup %1562 }
 0x5db   : > { %v817_v3 = vmul.f32 %v1563_v2, %v1557_v51 }
 0x5dd   : > { %1345 = vst.msk [vmem:[%s2046_s13 + $0x10] sm:$0xff] %vm396_vm2, %v817_v3 }
 0x5e0   : > { %v983_v4 = vpop.xlane.xlu0 %982 }
 0x5e1   : > { %1564 = vrcp.f32 %v983_v4 }
 0x5e4   : > { %v821_v10 = vpop.permute.xlu0 %820 }
 0x5eb   : > { %v1565_v5 = vpop.eup %1564 }
 0x5ec   : > { %v985_v6 = vmul.f32 %v1565_v5, %v1559_v56 }
 0x5ee   : > { %1349 = vst.msk [vmem:[%s2046_s13 + $0x18] sm:$0xff] %vm396_vm2, %v985_v6 }
 0x604   : > { %v647_v7 = vpop.xlane.xlu1 %646 }
 0x605   : > { %1566 = vrcp.f32 %v647_v7 }
 0x608   : > { %v989_v11 = vpop.permute.xlu1 %988 }
 0x60f   : > { %v1567_v8 = vpop.eup %1566 }
 0x610   : > { %v649_v9 = vmul.f32 %v1567_v8, %v1561_v60 }
 0x612   : > { %1341 = vst.msk [vmem:[%s2046_s13 + $0x8] sm:$0xff] %vm396_vm2, %v649_v9  ;;  %1414 = vmatmul.mubr.msk.f32.vlgmr.msra.gmra.mrb[6].mxu1 %vm396_vm2, %v649_v9 }
 0x613   : > { %1422 = vmatpush3.msra.mxu1 %v821_v10  ;;  %1423 = vmatprep.mubr.msk.f32.mxu1 %vm1764_vm0, %v1765_v1 }
 0x614   : > { %1431 = vmatprep.subr.mxu1 %v1765_v1 }
 0x616   : > { %1424 = vmatmul.mubr.msk.f32.vlgmr.msra.gmra.mrb[8].mxu1 %vm396_vm2, %v817_v3 }
 0x617   : > { %1432 = vmatpush3.msra.mxu1 %v989_v11  ;;  %1433 = vmatprep.mubr.msk.f32.mxu1 %vm1764_vm0, %v1765_v1 }
 0x61a   : > { %1434 = vmatmul.mubr.msk.f32.vlgmr.msra.gmra.mrb[10].mxu1 %vm396_vm2, %v985_v6 }
 0x6e5   : > { %v724_v18 = vpop.f32.mrb[6].mxu1 }
 0x6e6   : > { %1065 = vrot.lane.b32.xlu1 %v724_v18, %s1777_s14  ;;  %v1415_v19 = vpop.f32.mrb[7].mxu1 }
 0x6e9   : > { %v892_v20 = vpop.f32.mrb[8].mxu1 }
 0x6ea   : > { %1069 = vrot.lane.b32.xlu0 %v892_v20, %s1778_s16  ;;  %v1425_v1 = vpop.f32.mrb[9].mxu1  ;;  %s1660_s16 = scalar_lea.vmem %s1659_s29, 1024 }
 0x6eb   : > { %p1662_p9 = scmp.lt.s32.totalorder %s1660_s16, %s1654_s10 }
 0x6ed   : > { %v1060_v21 = vpop.f32.mrb[10].mxu1  ;;  %p1663_p12 = por %p1662_p9, %p1661_p7 }
 0x6ee   : > { %1073 = vrot.lane.b32.xlu1 %v1060_v21, %s1779_s7  ;;  %v1435_v0 = vpop.f32.mrb[11].mxu1 }
 0x6ef   : > { %p1664_p2 = pnand %p1663_p12, %p1657_p3 }
 0x758   : > { %v1066_v22 = vpop.permute.xlu1 %1065 }
 0x759   : > { %v1076_v24 = vsel %vm396_vm2, %v2059_v39, %v1066_v22 }
 0x75c   : > { %v1070_v23 = vpop.permute.xlu0 %1069 }
 0x75d   : > { %v1078_v25 = vsel %vm1077_vm3, %v1076_v24, %v1070_v23 }
 0x760   : > { %v1074_v26 = vpop.permute.xlu1 %1073 }
 0x761   : > { %v1080_v27 = vsel %vm1079_vm4, %v1078_v25, %v1074_v26 }
 0x762   : > { %1445 = vmatmul.mubr.msk.f32.vlgmr.msra.gmra.mrb[6].mxu0 %vm319_vm1, %v1080_v27 }
 0x763   : > { %1667 = shalt.err (!%p1664_p2)
}
 0x764   : > { %s1668_s13 = scalar_lea.hbm %s2095_s20, 512  ;;  %s1672_s12 = scalar_lea.hbm %s2185_s5, 1024 }
 0x765   : > { %p1669_p13 = scmp.ne.s32.totalorder %s2095_s20, %s1668_s13  ;;  %p1673_p4 = scmp.lt.u32.totalorder %s2095_s20, %s2185_s5 }
 0x766   : > { %p1674_p5 = scmp.lt.u32.totalorder %s1672_s12, %s1668_s13  ;;  %p1676_p11 = scmp.lt.u32.totalorder %s1668_s13, %s2095_s20 }
 0x767   : > { %p1670_p6 = pnand %p1669_p13, %p2202_p0 }
 0x768   : > { %p1675_p8 = por %p1674_p5, %p1673_p4 }
 0x769   : > { %p1671_p10 = pneg %p1670_p6 }
 0x76a   : > { %p1677_p1 = por %p1676_p11, %p1675_p8 }
 0x76c   : > { %p1678_p3 = pnand %p1677_p1, %p1671_p10 }
 0x76e   : > { %1681 = shalt.err (!%p1678_p3)
}
 0x76f   : > { %s1781_s10 = smov 128   ;;  %s1782_s16 = smov 256   ;;  %v1351_v28 = vld [vmem:[%s2184_s4] ss:$0 sm:$0xff] }
 0x770   : > { %1469 = dma.vmem_to_hbm [thread:$0]  (%p2202_p0), %s2098_s15, 512, %s2095_s20, %s1167_s8, %s1781_s10, %s1782_s16, %s1777_s14  }
 0x771   : > { %s306_s13 = scalar_lea.vmem [#allocation9], %s1329_s30  ;;  %s2135_s0 = scalar_lea.hbm %s2186_s6, %s1355_s17 }
 0x772   : > { %s1200_s12 = sshll.u32 %s306_s13, 4  ;;  %s1172_s14 = scalar_lea.sflag [#allocation10], %s1988_s18  ;;  %s2137_s12 = int_to_ptr.vmem [resolvable:$true] %s1200_s12 }
 0x773   : > { %s1682_s20 = scalar_lea.vmem %s2137_s12, 128  ;;  %s1783_s30 = smov [#allocation9]  }
 0x774   : > { %p1683_p7 = scmp.ne.s32.totalorder %s2137_s12, %s1682_s20  ;;  %s1686_s25 = sshll.u32 %s1783_s30, 4  ;;  %s1687_s25 = int_to_ptr.vmem [resolvable:$false] %s1686_s25 }
 0x775   : > { %s1688_s15 = scalar_lea.vmem %s1687_s25, 256  ;;  %p1689_p2 = scmp.lt.s32.totalorder %s2137_s12, %s1687_s25 }
 0x776   : > { %p1684_p9 = pnand %p1683_p7, %p2202_p0  ;;  %p1690_p13 = scmp.lt.s32.totalorder %s1688_s15, %s1682_s20 }
 0x778   : > { %p1685_p12 = pneg %p1684_p9  ;;  %p1691_p6 = por %p1690_p13, %p1689_p2 }
 0x77a   : > { %p1692_p10 = pnand %p1691_p6, %p1685_p12 }
 0x835   : > { %v1161_v29 = vpop.f32.mrb[6].mxu0 }
 0x836   : > { %v1162_v30 = vadd.f32 %v1351_v28, %v1161_v29  ;;  %v1446_v31 = vpop.f32.mrb[7].mxu0 }
 0x838   : > { %1165 = vst.msk [vmem:[%s306_s13] sm:$0xff] %vm319_vm1, %v1162_v30 }
 0x839   : > { %1695 = shalt.err (!%p1692_p10)
}
 0x83a   : > { %s1696_s18 = scalar_lea.hbm %s2135_s0, 128  ;;  %s1700_s10 = scalar_lea.hbm %s2186_s6, 256 }
 0x83b   : > { %p1697_p4 = scmp.ne.s32.totalorder %s2135_s0, %s1696_s18  ;;  %p1701_p11 = scmp.lt.u32.totalorder %s2135_s0, %s2186_s6 }
 0x83c   : > { %p1702_p1 = scmp.lt.u32.totalorder %s1700_s10, %s1696_s18  ;;  %p1704_p7 = scmp.lt.u32.totalorder %s1696_s18, %s2135_s0 }
 0x83d   : > { %p1698_p5 = pnand %p1697_p4, %p2202_p0 }
 0x83e   : > { %p1703_p3 = por %p1702_p1, %p1701_p11 }
 0x83f   : > { %p1699_p8 = pneg %p1698_p5 }
 0x840   : > { %p1705_p9 = por %p1704_p7, %p1703_p3 }
 0x842   : > { %p1706_p12 = pnand %p1705_p9, %p1699_p8 }
 0x844   : > { %1709 = shalt.err (!%p1706_p12)
}
 0x845   : > { %1470 = dma.vmem_to_hbm [thread:$0]  (%p2202_p0), %s2137_s12, 128, %s2135_s0, %s1172_s14  }
 0x846 PF: > { %s1212_s19 = sand.u32 1, %s1744_s21   ;;  %p2203_p2 = scmp.ne.s32.totalorder %s2192_s28, 0 }
 0x847   : > { %p2204_p13 = scmp.ge.s32.totalorder %s1756_s24, 2  ;;  %s1213_s13 = scalar_lea.sflag [#allocation4], %s1212_s19 }
 0x849   : > { %p1485_p6 = pnand %p2204_p13, %p2203_p2 }
 0x84b   : > { %1735 = dma.done.wait (!%p1485_p6), %s1213_s13, 512  }
 0x84c   : > { %1737 = vsyncadd (!%p1485_p6), %s1213_s13, 4294966784  ;;  %s1222_s27 = scalar_lea.sflag [#allocation10], %s1212_s19 }
 0x84d   : > { %1739 = dma.done.wait (!%p1485_p6), %s1222_s27, 128  }
 0x84e   : > { %1741 = vsyncadd (!%p1485_p6), %s1222_s27, 4294967168  ;;  %p24_p0 = scmp.ge.s32.totalorder %s1929_s26, 4   ;;  %s2205_s21 = smov %s1748_s22 }
 0x84f   : > { %s2206_s22 = smov %s1752_s23  ;;  %s2207_s23 = smov %s1945_s11 }
 0x850   : > { %s2208_s24 = smov %s1929_s26  ;;  %26 = sbr.rel (!%p24_p0) target bundleno = 10 (0xa), region = 113 }
 0x857   :  { %1227 = vsyncpa [#allocation3], 1 }
 0x858   :  { %1229 = vsyncpa [#allocation3 + $0x1], 1 }
 0x859   :  { %1230 = vsyncpa [#allocation6], 1 }
 0x85a   :  { %1231 = vsyncpa [#allocation4], 1 }
 0x85b   :  { %1233 = vsyncpa [#allocation4 + $0x1], 1 }
 0x85c   :  { %1234 = vsyncpa [#allocation10], 1 }
 0x85d   :  { %1236 = vsyncpa [#allocation10 + $0x1], 1 }

</bundles_post_ra>
